<compile_context>
chip_gen: v5e
topology: v5e:2x2
jax: 0.10.0
libtpu: 0.0.40
codegen_flags: <defaults>
</compile_context>

<pallas_src>
import functools

import jax
import jax.numpy as jnp
from jax.experimental import pallas as pl
from jax.experimental.pallas import tpu as pltpu


def _round_up(x, m):
    return (x + m - 1) // m * m


def _img_embedding_kernel(x_ref, wconv_hbm, bconv_hbm, w1_hbm, w2_hbm,
                          out_ref, attn_ref,
                          wconv_v, bconv_v, w1_v, w2_v, sems,
                          *, hw_valid):
    """Fused per-grid-step kernel over a block of `bt` images.

    x_ref     : (bt*HWp, Dp)          bf16 feature map, channels last, padded
    w*_hbm    : raw HBM refs           grid-invariant weights
    out_ref   : (bt, hop_p, dimemb_p) f32 attention-pooled embedding
    attn_ref  : (bt, hop_p, HWp)      f32 attention map (softmax over HW)
    w*_v      : persistent VMEM scratch copies of the weights
    sems      : DMA semaphores for the one-time weight load
    """
    bt, hop_p, hw_p = attn_ref.shape
    dimemb_p = out_ref.shape[-1]

    # Grid-invariant weights: DMA HBM -> persistent VMEM scratch exactly once
    # per core.  The inner grid axis is "arbitrary", so each core (v7x has two)
    # starts its slice at program_id(1) == 0 and loads its own copy; the
    # scratch then persists across all remaining grid steps.  This keeps the
    # large wconv single-resident (~10 MB bf16 at real sizes) instead of the
    # ~20 MB a default double-buffered BlockSpec would allocate.
    @pl.when(pl.program_id(1) == 0)
    def _load_weights():
        copies = (
            pltpu.make_async_copy(wconv_hbm, wconv_v, sems.at[0]),
            pltpu.make_async_copy(bconv_hbm, bconv_v, sems.at[1]),
            pltpu.make_async_copy(w1_hbm, w1_v, sems.at[2]),
            pltpu.make_async_copy(w2_hbm, w2_v, sems.at[3]),
        )
        for cp in copies:
            cp.start()
        for cp in copies:
            cp.wait()

    # ---- fused heavy matmuls over all bt images at once (fills MXU rows) ----
    x = x_ref[...]                                              # bf16 already
    # spaConv (1x1 conv == matmul) + bias; cast once to bf16 and keep only
    # that copy live (used by fc1 and by the pooling matmul below).
    emb = (jnp.dot(x, wconv_v[...], preferred_element_type=jnp.float32)
           + bconv_v[...]).astype(jnp.bfloat16)                 # (bt*HWp, dimemb_p)

    # TODO(synk): nn.Dropout(p=0.5) is treated as eval-mode identity.
    hbar = jnp.maximum(
        jnp.dot(emb, w1_v[...], preferred_element_type=jnp.float32), 0.0)
    logits = jnp.dot(hbar.astype(jnp.bfloat16), w2_v[...],
                     preferred_element_type=jnp.float32)        # (bt*HWp, hop_p)

    # ---- vectorized tail: softmax over HW + attention pooling, whole block ----
    lg = jnp.transpose(logits.reshape(bt, hw_p, hop_p), (0, 2, 1))  # (bt,hop_p,HWp)
    if hw_p != hw_valid:   # static branch: mask padded HW positions out of softmax
        col = jax.lax.broadcasted_iota(jnp.int32, lg.shape, 2)
        lg = jnp.where(col < hw_valid, lg, -1e30)
    m = jnp.max(lg, axis=-1, keepdims=True)
    e = jnp.exp(lg - m)
    s = jnp.sum(e, axis=-1, keepdims=True)
    attn = e * pl.reciprocal(s, approx=True)                    # EUP, not VPU divide
    attn_ref[...] = attn

    # Attention pooling: bf16 operands, f32 accumulation on the MXU.
    emb3 = emb.reshape(bt, hw_p, dimemb_p)
    out_ref[...] = jnp.einsum("bph,bhd->bpd", attn.astype(jnp.bfloat16), emb3,
                              preferred_element_type=jnp.float32)


def _pick_vmem_limit():
    """~75% of physical VMEM: ~48 MiB on v7x (64 MiB/TC), ~96 MiB on v5e/v6e."""
    cap = 64 * 1024 * 1024  # conservative default (v7x per-TC size)
    try:
        info = pltpu.get_tpu_info()
        cap = int(getattr(info, "vmem_capacity_bytes", cap) or cap)
    except Exception:
        pass  # keep the conservative default if the query is unavailable
    return (cap * 3) // 4


def img_embedding_forward(x_nchw, wconv, bconv, w1, w2, *, block_b=8,
                          vmem_limit_bytes=None):
    """x_nchw: (B, D, h, w) feature map (output of the ResNet base_layer).

    wconv: (D, dimemb)             = spaConv.weight[:, :, 0, 0].T
    bconv: (dimemb,)               = spaConv.bias
    w1   : (dimemb, attn_hidden)   = fc1.weight.T  (no bias)
    w2   : (attn_hidden, attn_hop) = fc2.weight.T  (no bias)
    Returns (output (B, attn_hop*dimemb), attn (B, attn_hop, HW)), both f32.
    """
    B, D, H, W = x_nchw.shape
    HW = H * W
    dimemb = wconv.shape[1]
    hidden = w1.shape[1]
    hop = w2.shape[1]

    # Lane/sublane-aligned padded sizes.  HW is padded to a multiple of 16 so
    # the bf16 x block stays sublane-aligned for any bt (e.g. 49 -> 64).
    d_p = _round_up(D, 128)
    hw_p = _round_up(HW, 16)
    dimemb_p = _round_up(dimemb, 128)
    hidden_p = _round_up(hidden, 128)
    hop_p = _round_up(hop, 8)

    # Images per grid step.  Cap so the grid has >= 2 steps whenever B > 1,
    # letting the outer "parallel" axis feed both TensorCores on v7x.
    bt = max(1, min(block_b, B))
    if B > 1 and -(-B // bt) < 2:
        bt = (B + 1) // 2
    n_steps = -(-B // bt)
    n_outer = 2 if n_steps >= 2 else 1
    n_steps = _round_up(n_steps, n_outer)
    n_inner = n_steps // n_outer
    b_p = n_steps * bt

    # NCHW -> (B, HW, D) in bf16 (cast fused into the layout change so the
    # transpose writes half the bytes), then zero-pad.  Zero padding is exact:
    # padded weight rows/cols are zero and padded HW rows are masked in-kernel.
    # TODO(synk): a channels-last backbone output would remove this extra HBM
    #             round trip of x entirely.
    x_hwc = jnp.transpose(x_nchw.astype(jnp.bfloat16).reshape(B, D, HW), (0, 2, 1))
    x_pad = jnp.pad(x_hwc, ((0, b_p - B), (0, hw_p - HW), (0, d_p - D)))
    x_flat = x_pad.reshape(b_p * hw_p, d_p)                     # row-major view

    wconv_p = jnp.pad(wconv, ((0, d_p - D), (0, dimemb_p - dimemb))).astype(jnp.bfloat16)
    bconv_p = jnp.pad(bconv.reshape(1, dimemb),
                      ((0, 0), (0, dimemb_p - dimemb))).astype(jnp.float32)
    w1_p = jnp.pad(w1, ((0, dimemb_p - dimemb), (0, hidden_p - hidden))).astype(jnp.bfloat16)
    w2_p = jnp.pad(w2, ((0, hidden_p - hidden), (0, hop_p - hop))).astype(jnp.bfloat16)

    if vmem_limit_bytes is None:
        vmem_limit_bytes = _pick_vmem_limit()

    kernel = functools.partial(_img_embedding_kernel, hw_valid=HW)
    out_shape = (
        jax.ShapeDtypeStruct((b_p, hop_p, dimemb_p), jnp.float32),
        jax.ShapeDtypeStruct((b_p, hop_p, hw_p), jnp.float32),
    )

    grid_spec = pltpu.PrefetchScalarGridSpec(
        num_scalar_prefetch=0,
        grid=(n_outer, n_inner),
        in_specs=[
            # x is the only per-step streamed (double-buffered) input.
            pl.BlockSpec((bt * hw_p, d_p), lambda o, i: (o * n_inner + i, 0)),
            # Weights stay in HBM; loaded once per core into VMEM scratch.
            pl.BlockSpec(memory_space=pl.ANY),
            pl.BlockSpec(memory_space=pl.ANY),
            pl.BlockSpec(memory_space=pl.ANY),
            pl.BlockSpec(memory_space=pl.ANY),
        ],
        out_specs=[
            pl.BlockSpec((bt, hop_p, dimemb_p), lambda o, i: (o * n_inner + i, 0, 0)),
            pl.BlockSpec((bt, hop_p, hw_p), lambda o, i: (o * n_inner + i, 0, 0)),
        ],
        scratch_shapes=[
            pltpu.VMEM((d_p, dimemb_p), jnp.bfloat16),      # wconv (single copy)
            pltpu.VMEM((1, dimemb_p), jnp.float32),         # bconv
            pltpu.VMEM((dimemb_p, hidden_p), jnp.bfloat16), # w1
            pltpu.VMEM((hidden_p, hop_p), jnp.bfloat16),    # w2
            pltpu.SemaphoreType.DMA((4,)),
        ],
    )

    out_p, attn_p = pl.pallas_call(
        kernel,
        out_shape=out_shape,
        grid_spec=grid_spec,
        compiler_params=pltpu.CompilerParams(
            dimension_semantics=("parallel", "arbitrary"),
            vmem_limit_bytes=vmem_limit_bytes,
        ),
    )(x_flat, wconv_p, bconv_p, w1_p, w2_p)

    # Slice padding away; torch: out_img.view(B, -1) row-major flatten.
    output = out_p[:B, :hop, :dimemb].reshape(B, hop * dimemb)
    attn = attn_p[:B, :hop, :HW]
    return output, attn


def reference_forward(x_nchw, wconv, bconv, w1, w2):
    """Pure-JAX f32 mirror of the PyTorch forward (eval-mode dropout)."""
    B, D, H, W = x_nchw.shape
    HW = H * W
    dimemb = wconv.shape[1]
    emb = jnp.einsum('bdhw,de->behw', x_nchw, wconv) + bconv.reshape(1, -1, 1, 1)
    emb_t = jnp.transpose(emb.reshape(B, dimemb, HW), (0, 2, 1))   # (B, HW, dimemb)
    hbar = jnp.maximum(emb_t.reshape(-1, dimemb) @ w1, 0.0)
    attn = (hbar @ w2).reshape(B, HW, -1)
    attn = jnp.transpose(attn, (0, 2, 1))                          # (B, hop, HW)
    attn = jax.nn.softmax(attn, axis=2)
    out = jnp.einsum('bph,bhd->bpd', attn, emb_t)                  # (B, hop, dimemb)
    return out.reshape(B, -1), attn


if __name__ == "__main__":
    # Small TPU-friendly stand-ins for the real sizes (D=2048 -> 128,
    # dimemb=2400 -> 200, attn_hidden -> 96, attn_hop -> 5); the 7x7 spatial
    # size is kept so the HW=49 -> 64 padding + softmax-mask path is exercised,
    # and B=4 so the (parallel=2, arbitrary) grid + per-core weight load runs.
    B, D, Hh, Ww = 4, 128, 7, 7
    DIMEMB, ATTN_HIDDEN, ATTN_HOP = 200, 96, 5

    key = jax.random.PRNGKey(0)
    k_x, k_wc, k_bc, k_w1, k_w2 = jax.random.split(key, 5)

    x = jax.random.normal(k_x, (B, D, Hh, Ww), dtype=jnp.float32)
    # spaConv: Conv2d(D, dimemb, 1).weight is (dimemb, D, 1, 1); store its transpose.
    wconv = jax.random.normal(k_wc, (D, DIMEMB), dtype=jnp.float32) * 0.05
    bconv = jax.random.normal(k_bc, (DIMEMB,), dtype=jnp.float32) * 0.05
    # fc1: Linear(dimemb, attn_hidden, bias=False).weight.T
    w1 = jax.random.normal(k_w1, (DIMEMB, ATTN_HIDDEN), dtype=jnp.float32) * 0.05
    # fc2: Linear(attn_hidden, attn_hop, bias=False).weight.T
    w2 = jax.random.normal(k_w2, (ATTN_HIDDEN, ATTN_HOP), dtype=jnp.float32) * 0.05

    out, attn = img_embedding_forward(x, wconv, bconv, w1, w2)
    jax.block_until_ready((out, attn))

    ref_out, ref_attn = reference_forward(x, wconv, bconv, w1, w2)
    assert out.shape == (B, ATTN_HOP * DIMEMB)
    assert attn.shape == (B, ATTN_HOP, Hh * Ww)
    # bf16 matmul operands (incl. x and the pooling matmul) with f32 accumulation
    # and an approx softmax reciprocal -> looser tolerance than pure f32.
    assert jnp.allclose(out, ref_out, atol=5e-2, rtol=5e-2), (
        float(jnp.max(jnp.abs(out - ref_out))))
    assert jnp.allclose(attn, ref_attn, atol=5e-3, rtol=5e-2), (
        float(jnp.max(jnp.abs(attn - ref_attn))))

    print("KERNEL_OK")
</pallas_src>

<mosaic_0001>
module attributes {stable_mosaic.version = 11 : i64} {
  func.func @_img_embedding_kernel(%arg0: i32, %arg1: i32, %arg2: memref<128x128xbf16, #tpu.memory_space<vmem>>, %arg3: memref<128x256xbf16, #tpu.memory_space<any>>, %arg4: memref<1x256xf32, #tpu.memory_space<any>>, %arg5: memref<256x128xbf16, #tpu.memory_space<any>>, %arg6: memref<128x8xbf16, #tpu.memory_space<any>>, %arg7: memref<2x8x256xf32, #tpu.memory_space<vmem>>, %arg8: memref<2x8x64xf32, #tpu.memory_space<vmem>>, %arg9: memref<128x256xbf16, #tpu.memory_space<vmem>>, %arg10: memref<1x256xf32, #tpu.memory_space<vmem>>, %arg11: memref<256x128xbf16, #tpu.memory_space<vmem>>, %arg12: memref<128x8xbf16, #tpu.memory_space<vmem>>, %arg13: memref<4x!tpu.dma_semaphore, #tpu.memory_space<semaphore_mem>>) attributes {dimension_semantics = [#tpu.dimension_semantics<parallel>, #tpu.dimension_semantics<arbitrary>], iteration_bounds = array<i64: 2, 1>, scalar_prefetch = 0 : i64, scratch_operands = 5 : i64, tpu.core_type = #tpu.core_type<tc>, window_params = [{transform_indices = @transform_0, window_bounds = array<i64: 128, 128>}, {}, {}, {}, {}, {transform_indices = @transform_5, window_bounds = array<i64: 2, 8, 256>}, {transform_indices = @transform_6, window_bounds = array<i64: 2, 8, 64>}]} {
    %c0_i32 = arith.constant 0 : i32
    %0 = arith.cmpi eq, %arg1, %c0_i32 : i32
    %1 = arith.extui %0 : i1 to i32
    %c0_i32_0 = arith.constant 0 : i32
    %2 = arith.cmpi ne, %1, %c0_i32_0 : i32
    scf.if %2 {
      %c0_i32_23 = arith.constant 0 : i32
      %39 = tpu.memref_slice %arg13[%c0_i32_23] : memref<4x!tpu.dma_semaphore, #tpu.memory_space<semaphore_mem>> -> memref<1x!tpu.dma_semaphore, #tpu.memory_space<semaphore_mem>>
      %40 = tpu.memref_squeeze %39 : memref<1x!tpu.dma_semaphore, #tpu.memory_space<semaphore_mem>> -> memref<!tpu.dma_semaphore, #tpu.memory_space<semaphore_mem>>
      tpu.enqueue_dma source(%arg3 : memref<128x256xbf16, #tpu.memory_space<any>>) target(%arg9 : memref<128x256xbf16, #tpu.memory_space<vmem>>) target_semaphore(%40 : memref<!tpu.dma_semaphore, #tpu.memory_space<semaphore_mem>>)
      %c1_i32 = arith.constant 1 : i32
      %41 = tpu.memref_slice %arg13[%c1_i32] : memref<4x!tpu.dma_semaphore, #tpu.memory_space<semaphore_mem>> -> memref<1x!tpu.dma_semaphore, #tpu.memory_space<semaphore_mem>>
      %42 = tpu.memref_squeeze %41 : memref<1x!tpu.dma_semaphore, #tpu.memory_space<semaphore_mem>> -> memref<!tpu.dma_semaphore, #tpu.memory_space<semaphore_mem>>
      tpu.enqueue_dma source(%arg4 : memref<1x256xf32, #tpu.memory_space<any>>) target(%arg10 : memref<1x256xf32, #tpu.memory_space<vmem>>) target_semaphore(%42 : memref<!tpu.dma_semaphore, #tpu.memory_space<semaphore_mem>>)
      %c2_i32 = arith.constant 2 : i32
      %43 = tpu.memref_slice %arg13[%c2_i32] : memref<4x!tpu.dma_semaphore, #tpu.memory_space<semaphore_mem>> -> memref<1x!tpu.dma_semaphore, #tpu.memory_space<semaphore_mem>>
      %44 = tpu.memref_squeeze %43 : memref<1x!tpu.dma_semaphore, #tpu.memory_space<semaphore_mem>> -> memref<!tpu.dma_semaphore, #tpu.memory_space<semaphore_mem>>
      tpu.enqueue_dma source(%arg5 : memref<256x128xbf16, #tpu.memory_space<any>>) target(%arg11 : memref<256x128xbf16, #tpu.memory_space<vmem>>) target_semaphore(%44 : memref<!tpu.dma_semaphore, #tpu.memory_space<semaphore_mem>>)
      %c3_i32 = arith.constant 3 : i32
      %45 = tpu.memref_slice %arg13[%c3_i32] : memref<4x!tpu.dma_semaphore, #tpu.memory_space<semaphore_mem>> -> memref<1x!tpu.dma_semaphore, #tpu.memory_space<semaphore_mem>>
      %46 = tpu.memref_squeeze %45 : memref<1x!tpu.dma_semaphore, #tpu.memory_space<semaphore_mem>> -> memref<!tpu.dma_semaphore, #tpu.memory_space<semaphore_mem>>
      tpu.enqueue_dma source(%arg6 : memref<128x8xbf16, #tpu.memory_space<any>>) target(%arg12 : memref<128x8xbf16, #tpu.memory_space<vmem>>) target_semaphore(%46 : memref<!tpu.dma_semaphore, #tpu.memory_space<semaphore_mem>>)
      %c0_i32_24 = arith.constant 0 : i32
      %47 = tpu.memref_slice %arg13[%c0_i32_24] : memref<4x!tpu.dma_semaphore, #tpu.memory_space<semaphore_mem>> -> memref<1x!tpu.dma_semaphore, #tpu.memory_space<semaphore_mem>>
      %48 = tpu.memref_squeeze %47 : memref<1x!tpu.dma_semaphore, #tpu.memory_space<semaphore_mem>> -> memref<!tpu.dma_semaphore, #tpu.memory_space<semaphore_mem>>
      tpu.wait_dma2 semaphore(%48 : memref<!tpu.dma_semaphore, #tpu.memory_space<semaphore_mem>>) src(%arg3 : memref<128x256xbf16, #tpu.memory_space<any>>) dst(%arg9 : memref<128x256xbf16, #tpu.memory_space<vmem>>)
      %c1_i32_25 = arith.constant 1 : i32
      %49 = tpu.memref_slice %arg13[%c1_i32_25] : memref<4x!tpu.dma_semaphore, #tpu.memory_space<semaphore_mem>> -> memref<1x!tpu.dma_semaphore, #tpu.memory_space<semaphore_mem>>
      %50 = tpu.memref_squeeze %49 : memref<1x!tpu.dma_semaphore, #tpu.memory_space<semaphore_mem>> -> memref<!tpu.dma_semaphore, #tpu.memory_space<semaphore_mem>>
      tpu.wait_dma2 semaphore(%50 : memref<!tpu.dma_semaphore, #tpu.memory_space<semaphore_mem>>) src(%arg4 : memref<1x256xf32, #tpu.memory_space<any>>) dst(%arg10 : memref<1x256xf32, #tpu.memory_space<vmem>>)
      %c2_i32_26 = arith.constant 2 : i32
      %51 = tpu.memref_slice %arg13[%c2_i32_26] : memref<4x!tpu.dma_semaphore, #tpu.memory_space<semaphore_mem>> -> memref<1x!tpu.dma_semaphore, #tpu.memory_space<semaphore_mem>>
      %52 = tpu.memref_squeeze %51 : memref<1x!tpu.dma_semaphore, #tpu.memory_space<semaphore_mem>> -> memref<!tpu.dma_semaphore, #tpu.memory_space<semaphore_mem>>
      tpu.wait_dma2 semaphore(%52 : memref<!tpu.dma_semaphore, #tpu.memory_space<semaphore_mem>>) src(%arg5 : memref<256x128xbf16, #tpu.memory_space<any>>) dst(%arg11 : memref<256x128xbf16, #tpu.memory_space<vmem>>)
      %c3_i32_27 = arith.constant 3 : i32
      %53 = tpu.memref_slice %arg13[%c3_i32_27] : memref<4x!tpu.dma_semaphore, #tpu.memory_space<semaphore_mem>> -> memref<1x!tpu.dma_semaphore, #tpu.memory_space<semaphore_mem>>
      %54 = tpu.memref_squeeze %53 : memref<1x!tpu.dma_semaphore, #tpu.memory_space<semaphore_mem>> -> memref<!tpu.dma_semaphore, #tpu.memory_space<semaphore_mem>>
      tpu.wait_dma2 semaphore(%54 : memref<!tpu.dma_semaphore, #tpu.memory_space<semaphore_mem>>) src(%arg6 : memref<128x8xbf16, #tpu.memory_space<any>>) dst(%arg12 : memref<128x8xbf16, #tpu.memory_space<vmem>>)
    } else {
    }
    %c0 = arith.constant 0 : index
    %c0_1 = arith.constant 0 : index
    %3 = vector.load %arg2[%c0, %c0_1] : memref<128x128xbf16, #tpu.memory_space<vmem>>, vector<128x128xbf16>
    %c0_2 = arith.constant 0 : index
    %c0_3 = arith.constant 0 : index
    %4 = vector.load %arg9[%c0_2, %c0_3] : memref<128x256xbf16, #tpu.memory_space<vmem>>, vector<128x256xbf16>
    %cst = arith.constant dense<0.000000e+00> : vector<128x256xf32>
    %5 = tpu.matmul %3, %4, %cst {dimension_numbers = #tpu.dot_dimension_numbers<[1], [0], [0], [1], [0, 0, 1, 1], [], []>} : vector<128x128xbf16>, vector<128x256xbf16>, vector<128x256xf32> -> vector<128x256xf32>
    %c0_4 = arith.constant 0 : index
    %c0_5 = arith.constant 0 : index
    %6 = vector.load %arg10[%c0_4, %c0_5] : memref<1x256xf32, #tpu.memory_space<vmem>>, vector<1x256xf32>
    %7 = vector.broadcast %6 : vector<1x256xf32> to vector<128x256xf32>
    %8 = arith.addf %5, %7 : vector<128x256xf32>
    %9 = arith.truncf %8 : vector<128x256xf32> to vector<128x256xbf16>
    %c0_6 = arith.constant 0 : index
    %c0_7 = arith.constant 0 : index
    %10 = vector.load %arg11[%c0_6, %c0_7] : memref<256x128xbf16, #tpu.memory_space<vmem>>, vector<256x128xbf16>
    %cst_8 = arith.constant dense<0.000000e+00> : vector<128x128xf32>
    %11 = tpu.matmul %9, %10, %cst_8 {dimension_numbers = #tpu.dot_dimension_numbers<[1], [0], [0], [1], [0, 0, 1, 1], [], []>} : vector<128x256xbf16>, vector<256x128xbf16>, vector<128x128xf32> -> vector<128x128xf32>
    %cst_9 = arith.constant 0.000000e+00 : f32
    %12 = vector.broadcast %cst_9 : f32 to vector<128x128xf32>
    %13 = arith.maximumf %11, %12 : vector<128x128xf32>
    %14 = arith.truncf %13 : vector<128x128xf32> to vector<128x128xbf16>
    %c0_10 = arith.constant 0 : index
    %c0_11 = arith.constant 0 : index
    %15 = vector.load %arg12[%c0_10, %c0_11] : memref<128x8xbf16, #tpu.memory_space<vmem>>, vector<128x8xbf16>
    %cst_12 = arith.constant dense<0.000000e+00> : vector<128x8xf32>
    %16 = tpu.matmul %14, %15, %cst_12 {dimension_numbers = #tpu.dot_dimension_numbers<[1], [0], [0], [1], [0, 0, 1, 1], [], []>} : vector<128x128xbf16>, vector<128x8xbf16>, vector<128x8xf32> -> vector<128x8xf32>
    %17 = vector.shape_cast %16 : vector<128x8xf32> to vector<2x64x8xf32>
    %18 = tpu.transpose %17, [0, 2, 1] : vector<2x64x8xf32> -> vector<2x8x64xf32>
    %19 = tpu.iota {dimensions = array<i32: 2>} : vector<2x8x64xi32>
    %c49_i32 = arith.constant 49 : i32
    %20 = vector.broadcast %c49_i32 : i32 to vector<2x8x64xi32>
    %21 = arith.cmpi slt, %19, %20 : vector<2x8x64xi32>
    %cst_13 = arith.constant -1.000000e+30 : f32
    %22 = vector.broadcast %cst_13 : f32 to vector<2x8x64xf32>
    %23 = arith.select %21, %18, %22 : vector<2x8x64xi1>, vector<2x8x64xf32>
    %cst_14 = arith.constant dense<0xFF800000> : vector<2x8xf32>
    %24 = vector.multi_reduction <maximumf>, %23, %cst_14 [2] : vector<2x8x64xf32> to vector<2x8xf32>
    %25 = vector.shape_cast %24 : vector<2x8xf32> to vector<2x8x1xf32>
    %26 = vector.broadcast %25 : vector<2x8x1xf32> to vector<2x8x64xf32>
    %27 = arith.subf %23, %26 : vector<2x8x64xf32>
    %28 = math.exp %27 : vector<2x8x64xf32>
    %cst_15 = arith.constant dense<0.000000e+00> : vector<2x8xf32>
    %29 = vector.multi_reduction <add>, %28, %cst_15 [2] : vector<2x8x64xf32> to vector<2x8xf32>
    %30 = vector.shape_cast %29 : vector<2x8xf32> to vector<2x8x1xf32>
    %31 = tpu.reciprocal %30 {approx = true} : vector<2x8x1xf32> -> vector<2x8x1xf32>
    %32 = vector.broadcast %31 : vector<2x8x1xf32> to vector<2x8x64xf32>
    %33 = arith.mulf %28, %32 : vector<2x8x64xf32>
    %c0_16 = arith.constant 0 : index
    %c0_17 = arith.constant 0 : index
    %c0_18 = arith.constant 0 : index
    %34 = vector.load %arg8[%c0_16, %c0_17, %c0_18] : memref<2x8x64xf32, #tpu.memory_space<vmem>>, vector<2x8x64xf32>
    tpu.vector_store %arg8[%c0_16, %c0_17, %c0_18], %33 {strides = array<i32>} : memref<2x8x64xf32, #tpu.memory_space<vmem>>, vector<2x8x64xf32>,
    %35 = vector.shape_cast %9 : vector<128x256xbf16> to vector<2x64x256xbf16>
    %36 = arith.truncf %33 : vector<2x8x64xf32> to vector<2x8x64xbf16>
    "tpu.trace_start"() <{level = 10 : i32, message = "bph,bhd->bpd"}> : () -> ()
    %cst_19 = arith.constant dense<0.000000e+00> : vector<2x8x256xf32>
    %37 = tpu.matmul %36, %35, %cst_19 {dimension_numbers = #tpu.dot_dimension_numbers<[2], [1], [1], [2], [0, 0, 0, 1, 1, 2], [0], [0]>} : vector<2x8x64xbf16>, vector<2x64x256xbf16>, vector<2x8x256xf32> -> vector<2x8x256xf32>
    "tpu.trace_stop"() : () -> ()
    %c0_20 = arith.constant 0 : index
    %c0_21 = arith.constant 0 : index
    %c0_22 = arith.constant 0 : index
    %38 = vector.load %arg7[%c0_20, %c0_21, %c0_22] : memref<2x8x256xf32, #tpu.memory_space<vmem>>, vector<2x8x256xf32>
    tpu.vector_store %arg7[%c0_20, %c0_21, %c0_22], %37 {strides = array<i32>} : memref<2x8x256xf32, #tpu.memory_space<vmem>>, vector<2x8x256xf32>,
    return
  }
  func.func @transform_0(%arg0: i32, %arg1: i32) -> (i32, i32) {
    %c1_i32 = arith.constant 1 : i32
    %0 = arith.muli %arg0, %c1_i32 : i32
    %1 = arith.addi %0, %arg1 : i32
    %c0_i32 = arith.constant 0 : i32
    %c0_i32_0 = arith.constant 0 : i32
    return %1, %c0_i32 : i32, i32
  }
  func.func @transform_5(%arg0: i32, %arg1: i32) -> (i32, i32, i32) {
    %c1_i32 = arith.constant 1 : i32
    %0 = arith.muli %arg0, %c1_i32 : i32
    %1 = arith.addi %0, %arg1 : i32
    %c0_i32 = arith.constant 0 : i32
    %c0_i32_0 = arith.constant 0 : i32
    %c0_i32_1 = arith.constant 0 : i32
    return %1, %c0_i32, %c0_i32_0 : i32, i32, i32
  }
  func.func @transform_6(%arg0: i32, %arg1: i32) -> (i32, i32, i32) {
    %c1_i32 = arith.constant 1 : i32
    %0 = arith.muli %arg0, %c1_i32 : i32
    %1 = arith.addi %0, %arg1 : i32
    %c0_i32 = arith.constant 0 : i32
    %c0_i32_0 = arith.constant 0 : i32
    %c0_i32_1 = arith.constant 0 : i32
    return %1, %c0_i32, %c0_i32_0 : i32, i32, i32
  }
}

</mosaic_0001>

<bundles_post_ra>
// kernel: tpu_custom_call.1
= control target key start
LH: loop header
LB: loop body
LE: loop exit
PB: predicated region body
PF: predicated region fallthrough
CT: control target
= control target key end

     0   :  { %s2271_s0 = inlined_call_operand.hbm [shape: bf16[256,128], index: 0, kind: input, shape index: {}]   ;;  %s2272_s1 = inlined_call_operand.hbm [shape: bf16[128,256], index: 1, kind: input, shape index: {}]   ;;  %s2273_s2 = inlined_call_operand.vmem [shape: f32[1,256], index: 2, kind: input, shape index: {}]   ;;  %s2274_s3 = inlined_call_operand.hbm [shape: bf16[256,128], index: 3, kind: input, shape index: {}]   ;;  %s2275_s4 = inlined_call_operand.vmem [shape: bf16[128,8], index: 4, kind: input, shape index: {}]   ;;  %s2276_s5 = inlined_call_operand.hbm [shape: f32[4,8,256], index: 5, kind: output, shape index: {0}]   ;;  %s2277_s6 = inlined_call_operand.hbm [shape: f32[4,8,64], index: 6, kind: output, shape index: {1}]  }
   0x1   :  { %2279 = sst [smem:[#allocation29_spill]] %s2271_s0 }
   0x2   :  { %2280 = sst [smem:[#allocation30_spill]] %s2272_s1 }
   0x3   :  { %12 = vsyncpa [#allocation8], 0 }
   0x4   :  { %14 = vsyncpa [#allocation8 + $0x1], 0 }
   0x5   :  { %15 = vsyncpa [#allocation9], 0 }
   0x6   :  { %17 = vsyncpa [#allocation9 + $0x1], 0 }
   0x7   :  { %18 = vsyncpa [#allocation12], 0 }
   0x8   :  { %20 = vsyncpa [#allocation12 + $0x1], 0  ;;  %s2017_s21 = smov 0   ;;  %s2019_s22 = smov 0  }
   0x9   :  { %s2021_s23 = smov 0   ;;  %s2023_s24 = smov 0  }
   0xa   :  { %s2025_s25 = smov 0   ;;  %s2027_s26 = smov 0  }
   0xb LB: > { %s1392_s27 = sadd.s32 4294967295, %s1972_s26   ;;  %s1393_s28 = sadd.s32 4294967294, %s1972_s26   ;;  %s1972_s26 = sphi %s2027_s26, %s26_s26   ;;  %s1968_s25 = sphi %s2025_s25, %s2293_s25   ;;  %s1964_s24 = sphi %s2023_s24, %s2292_s24   ;;  %s1960_s23 = sphi %s2021_s23, %s2291_s23   ;;  %s1956_s22 = sphi %s2019_s22, %s2290_s22   ;;  %s1952_s21 = sphi %s2017_s21, %s2289_s21  }
   0xc   : > { %s38_s29 = sadd.s32 1, %s1968_s25  ;;  %s47_s30 = sadd.s32 1, %s1960_s23 }
   0xd   : > { %p40_p0 = scmp.ge.s32.totalorder %s38_s29, 2  ;;  %p54_p1 = scmp.ne.s32.totalorder %s1960_s23, %s1956_s22 }
   0xe   : > { %p55_p2 = scmp.eq.s32.totalorder %s1972_s26, 0  ;;  %p60_p3 = scmp.ne.s32.totalorder %s1956_s22, %s1952_s21 }
   0xf   : > { %s2295_s29 = smov (%p40_p0, %s38_s29), 0  ;;  %p61_p5 = scmp.eq.s32.totalorder %s1392_s27, 0 }
  0x10   : > { %2281 = sst [smem:[#allocation28_spill]] %s2295_s29  ;;  %p2058_p4 = por %p55_p2, %p54_p1 }
  0x11   : > { %s44_s8 = ssub.s32 %s1968_s25, %s2295_s29  ;;  %p86_p6 = scmp.eq.s32.totalorder %s1392_s27, 1 }
  0x12   : > { %p45_p7 = scmp.eq.s32.totalorder %s44_s8, 0  ;;  %p2064_p8 = por %p61_p5, %p60_p3 }
  0x13   : > { %p2068_p9 = por %p86_p6, %p54_p1  ;;  %p92_p10 = scmp.eq.s32.totalorder %s1393_s28, 1 }
  0x14   : > { %s2073_s11 = scalar_select %p45_p7, %s1960_s23, %s47_s30  }
  0x15   : > { %p2075_p11 = por %p92_p10, %p60_p3  ;;  %p1395_p12 = scmp.ge.s32.totalorder %s1972_s26, 2 }
  0x16   : > { %p1705_p13 = scmp.lt.s32.totalorder %s1972_s26, 2  ;;  %s140_s13 = sand.u32 1, %s1960_s23  }
  0x17   : > { %s1396_s14 = sshll.u32 %s140_s13, 6  ;;  %s1612_s15 = sshll.u32 %s1968_s25, 6 }
  0x18   : > { %s2286_s0 = sld [smem:[#allocation29_spill]]  ;;  %s144_s19 = scalar_lea.vmem [#allocation7], %s1396_s14 }
  0x19   : > { %s153_s20 = sshll.u32 %s144_s19, 4  ;;  %p1695_p0 = pnand %p1705_p13, %p2058_p4  ;;  %s154_s20 = int_to_ptr.vmem [resolvable:$true] %s153_s20 }
  0x1a   : > { %p1399_p1 = scmp.ge.s32.totalorder %s1972_s26, 1  ;;  %s141_s28 = scalar_lea.sflag [#allocation8], %s140_s13 }
  0x1b   : > { %s1974_s30 = smov 64   ;;  %s1975_s8 = smov 4  }
  0x1c   : > { %p161_p2 = scmp.lt.s32.totalorder %s1972_s26, 3 }
  0x1e   : > { %s150_s18 = scalar_lea.hbm %s2286_s0, %s1612_s15  ;;  %p162_p3 = pnand %p1399_p1, %p161_p2 }
  0x1f   : > { %s151_s27 = sshll.u32 %s150_s18, 4  ;;  %s2091_s29 = sand.u32 (!%p162_p3), 1, %s1956_s22   ;;  %s152_s27 = int_to_ptr.hbm [resolvable:$true] %s151_s27 }
  0x20   : > { %1697 = dma.hbm_to_vmem [thread:$0]  (!%p1695_p0), %s152_s27, 1024, %s154_s20, %s141_s28, %s1974_s30, %s1974_s30, %s1975_s8  }
  0x21   : > { %165 = sbr.rel (%p162_p3) target bundleno = 1140 (0x474), region = 24  ;;  %s1400_s14 = sshll.u32 (!%p162_p3), %s2091_s29, 6 }
  0x22   : > { %s168_s15 = scalar_lea.sflag (!%p162_p3), [#allocation8], %s2091_s29  ;;  %s2095_s16 = scalar_lea.vmem (!%p162_p3), [#allocation7], %s1400_s14 }
  0x26   : > { %1931 = dma.done.wait (%p2064_p8), %s168_s15, 1024  }
  0x27   : > { %1933 = vsyncadd (%p2064_p8), %s168_s15, 4294966272  ;;  %s1401_s7 = sshll.u32 %s2091_s29, 5  ;;  %s1402_s13 = sshll.u32 %s2091_s29, 4  ;;  %v237_v0 = vld [vmem:[%s2273_s2] sm:$0x3] }
  0x28   : > { %s2287_s1 = sld [smem:[#allocation30_spill]]  ;;  %s1976_s20 = smov [#allocation2]   ;;  %238 = vst [vmem:[#allocation3] sm:$0x3] %v237_v0 }
  0x29   : > { %s218_s27 = sshll.u32 %s1976_s20, 4  ;;  %s2109_s9 = scalar_lea.vmem [#allocation10], %s1401_s7  ;;  %s219_s27 = int_to_ptr.vmem [resolvable:$true] %s218_s27 }
  0x2a   : > { %s2111_s8 = scalar_lea.vmem [#allocation11], %s1402_s13 }
  0x2e   : > { %s216_s19 = sshll.u32 %s2287_s1, 4  ;;  %s217_s19 = int_to_ptr.hbm [resolvable:$true] %s216_s19 }
  0x2f   : > { %221 = dma.hbm_to_vmem [thread:$0]  %s217_s19, 2048, %s219_s27, [#allocation6] }
  0x30   : > { %256 = vsyncadd [#allocation6 + $0x1], 32  ;;  %s265_s17 = sshll.u32 %s2274_s3, 4  ;;  %v282_v1 = vld [vmem:[%s2275_s4] sm:$0xff]  ;;  %v284_v2 = vld [vmem:[%s2275_s4 + $0x8] sm:$0xff]  ;;  %s1977_s27 = smov [#allocation4]   ;;  %s266_s17 = int_to_ptr.hbm [resolvable:$true] %s265_s17 }
  0x31   : > { %s267_s28 = sshll.u32 %s1977_s27, 4  ;;  %283 = vst [vmem:[#allocation5 + $0x30] sm:$0xff] %v282_v1  ;;  %v286_v3 = vld [vmem:[%s2275_s4 + $0x10] sm:$0xff]  ;;  %v288_v4 = vld [vmem:[%s2275_s4 + $0x18] sm:$0xff]  ;;  %v290_v5 = vld [vmem:[%s2275_s4 + $0x20] sm:$0xff]  ;;  %s268_s28 = int_to_ptr.vmem [resolvable:$true] %s267_s28 }
  0x32   : > { %285 = vst [vmem:[#allocation5] sm:$0xff] %v284_v2  ;;  %270 = dma.hbm_to_vmem [thread:$0]  %s266_s17, 2048, %s268_s28, [#allocation6 + $0x2]  ;;  %v292_v6 = vld [vmem:[%s2275_s4 + $0x28] sm:$0xff]  ;;  %v294_v7 = vld [vmem:[%s2275_s4 + $0x30] sm:$0xff]  ;;  %v296_v8 = vld [vmem:[%s2275_s4 + $0x38] sm:$0xff] }
  0x33   : > { %287 = vst [vmem:[#allocation5 + $0x18] sm:$0xff] %v286_v3 }
  0x34   : > { %289 = vst [vmem:[#allocation5 + $0x10] sm:$0xff] %v288_v4 }
  0x35   : > { %291 = vst [vmem:[#allocation5 + $0x8] sm:$0xff] %v290_v5 }
  0x36   : > { %293 = vst [vmem:[#allocation5 + $0x20] sm:$0xff] %v292_v6 }
  0x37   : > { %295 = vst [vmem:[#allocation5 + $0x28] sm:$0xff] %v294_v7 }
  0x38   : > { %297 = vst [vmem:[#allocation5 + $0x38] sm:$0xff] %v296_v8 }
  0x39   : > { %303 = vsyncadd [#allocation6 + $0x3], 1024 }
  0x3a   : > { %1934 = dma.done.wait [#allocation6], 2048 }
  0x3b   : > { %1935 = vsyncadd [#allocation6], 4294965248 }
  0x3c   : > { %1936 = dma.done.wait [#allocation6 + $0x1], 32 }
  0x3d   : > { %1937 = vsyncadd [#allocation6 + $0x1], 4294967264 }
  0x3e   : > { %1938 = dma.done.wait [#allocation6 + $0x2], 2048 }
  0x3f   : > { %1939 = vsyncadd [#allocation6 + $0x2], 4294965248 }
  0x40   : > { %1940 = dma.done.wait [#allocation6 + $0x3], 1024 }
  0x41   : > { %1941 = vsyncadd [#allocation6 + $0x3], 4294966272  ;;  %v1493_v9 = vld [vmem:[#allocation2 + $0x70] sm:$0xf]  ;;  %v1636_v10 = vld [vmem:[#allocation2 + $0x74] sm:$0xf0] }
  0x42   : > { %v1635_v11 = vld [vmem:[#allocation2 + $0x74] sm:$0xf]  ;;  %v1494_v12 = vor.u32 %v1636_v10, %v1493_v9  ;;  %v1495_v13 = vld [vmem:[#allocation2 + $0x78] sm:$0xf0]  ;;  %v1485_v14 = vld [vmem:[#allocation2 + $0x60] sm:$0xf] }
  0x43   : > { %v1634_v15 = vld [vmem:[#allocation2 + $0x64] sm:$0xf0]  ;;  %v1498_v16 = vor.u32 %v1635_v11, %v1495_v13  ;;  %v1633_v17 = vld [vmem:[#allocation2 + $0x64] sm:$0xf]  ;;  %v1487_v18 = vld [vmem:[#allocation2 + $0x68] sm:$0xf0] }
  0x44   : > { %484 = vmatpush.bf16.msra.mxu0 %v1494_v12  ;;  %v1486_v19 = vor.u32 %v1634_v15, %v1485_v14  ;;  %1664 = vmatpush.bf16.msra.mxu2 %v1494_v12  ;;  %v1490_v20 = vor.u32 %v1633_v17, %v1487_v18  ;;  %v1477_v21 = vld [vmem:[#allocation2 + $0x50] sm:$0xf]  ;;  %v1632_v22 = vld [vmem:[#allocation2 + $0x54] sm:$0xf0]  ;;  %v1631_v23 = vld [vmem:[#allocation2 + $0x54] sm:$0xf] }
  0x45   : > { %533 = vmatpush.bf16.msra.mxu1 %v1498_v16  ;;  %1665 = vmatpush.bf16.msra.mxu3 %v1494_v12  ;;  %v1479_v24 = vld [vmem:[#allocation2 + $0x58] sm:$0xf0]  ;;  %v1478_v25 = vor.u32 %v1632_v22, %v1477_v21  ;;  %v1469_v27 = vld [vmem:[#allocation2 + $0x40] sm:$0xf]  ;;  %v1630_v28 = vld [vmem:[#allocation2 + $0x44] sm:$0xf0] }
  0x46   : > { %v1482_v26 = vor.u32 %v1631_v23, %v1479_v24  ;;  %v1629_v29 = vld [vmem:[#allocation2 + $0x44] sm:$0xf]  ;;  %v1471_v30 = vld [vmem:[#allocation2 + $0x48] sm:$0xf0]  ;;  %v1470_v31 = vor.u32 %v1630_v28, %v1469_v27  ;;  %v1461_v33 = vld [vmem:[#allocation2 + $0x30] sm:$0xf] }
  0x47   : > { %v1474_v32 = vor.u32 %v1629_v29, %v1471_v30  ;;  %v1628_v34 = vld [vmem:[#allocation2 + $0x34] sm:$0xf0]  ;;  %v1627_v35 = vld [vmem:[#allocation2 + $0x34] sm:$0xf]  ;;  %v1463_v36 = vld [vmem:[#allocation2 + $0x38] sm:$0xf0] }
  0x48   : > { %485 = vmatpush.bf16.msra.mxu0 %v1486_v19  ;;  %1666 = vmatpush.bf16.msra.mxu2 %v1486_v19  ;;  %v1462_v37 = vor.u32 %v1628_v34, %v1461_v33  ;;  %v1466_v38 = vor.u32 %v1627_v35, %v1463_v36  ;;  %v1453_v39 = vld [vmem:[#allocation2 + $0x20] sm:$0xf]  ;;  %v1626_v40 = vld [vmem:[#allocation2 + $0x24] sm:$0xf0]  ;;  %v1625_v41 = vld [vmem:[#allocation2 + $0x24] sm:$0xf] }
  0x49   : > { %534 = vmatpush.bf16.msra.mxu1 %v1490_v20  ;;  %1667 = vmatpush.bf16.msra.mxu3 %v1486_v19  ;;  %v1455_v42 = vld [vmem:[#allocation2 + $0x28] sm:$0xf0]  ;;  %v1454_v43 = vor.u32 %v1626_v40, %v1453_v39  ;;  %v1445_v45 = vld [vmem:[#allocation2 + $0x10] sm:$0xf]  ;;  %v1624_v46 = vld [vmem:[#allocation2 + $0x14] sm:$0xf0] }
  0x4a   : > { %v1458_v44 = vor.u32 %v1625_v41, %v1455_v42  ;;  %v1623_v47 = vld [vmem:[#allocation2 + $0x14] sm:$0xf]  ;;  %v1447_v48 = vld [vmem:[#allocation2 + $0x18] sm:$0xf0]  ;;  %v1446_v49 = vor.u32 %v1624_v46, %v1445_v45  ;;  %v1437_v51 = vld [vmem:[#allocation2] sm:$0xf] }
  0x4b   : > { %v1450_v50 = vor.u32 %v1623_v47, %v1447_v48  ;;  %v1622_v52 = vld [vmem:[#allocation2 + $0x4] sm:$0xf0]  ;;  %v1621_v53 = vld [vmem:[#allocation2 + $0x4] sm:$0xf]  ;;  %v1439_v54 = vld [vmem:[#allocation2 + $0x8] sm:$0xf0] }
  0x4c   : > { %486 = vmatpush.bf16.msra.mxu0 %v1478_v25  ;;  %1668 = vmatpush.bf16.msra.mxu2 %v1478_v25  ;;  %v1438_v55 = vor.u32 %v1622_v52, %v1437_v51  ;;  %v1442_v56 = vor.u32 %v1621_v53, %v1439_v54  ;;  %v1652_v57 = vld [vmem:[#allocation4 + $0x78] sm:$0xff]  ;;  %v1613_v58 = vld [vmem:[%s2095_s16] sm:$0xff]  ;;  %v1651_v60 = vld [vmem:[#allocation4 + $0x70] sm:$0xff]  ;;  %vm1110_vm1 = vcmask 523264   ;;  %s1237_s13 = sshll.u32 %s2111_s8, 4  ;;  %s1205_s0 = scalar_lea.sflag [#allocation12], %s2091_s29  ;;  %s1238_s13 = int_to_ptr.vmem [resolvable:$true] %s1237_s13 }
  0x4d   : > { %535 = vmatpush.bf16.msra.mxu1 %v1482_v26  ;;  %1669 = vmatpush.bf16.msra.mxu3 %v1478_v25  ;;  %v1616_v59 = vld [vmem:[%s2095_s16 + $0x18] sm:$0xff]  ;;  %v1614_v61 = vld [vmem:[%s2095_s16 + $0x8] sm:$0xff]  ;;  %v1617_v62 = vld [vmem:[%s2095_s16 + $0x20] sm:$0xff]  ;;  %s1870_s19 = scalar_lea.hbm %s2277_s6, 32 }
  0x4e   : > { %v1650_v63 = vld [vmem:[#allocation4 + $0x68] sm:$0xff]  ;;  %v1615_v0 = vld [vmem:[%s2095_s16 + $0x10] sm:$0xff]  ;;  %v1649_v2 = vld [vmem:[#allocation4 + $0x60] sm:$0xff] }
  0x4f   : > { %v1618_v1 = vld [vmem:[%s2095_s16 + $0x28] sm:$0xff]  ;;  %v1619_v3 = vld [vmem:[%s2095_s16 + $0x30] sm:$0xff]  ;;  %v1648_v4 = vld [vmem:[#allocation4 + $0x58] sm:$0xff] }
  0x50   : > { %487 = vmatpush.bf16.msra.mxu0 %v1470_v31  ;;  %1670 = vmatpush.bf16.msra.mxu2 %v1470_v31  ;;  %v1620_v5 = vld [vmem:[%s2095_s16 + $0x38] sm:$0xff]  ;;  %v1647_v6 = vld [vmem:[#allocation4 + $0x50] sm:$0xff]  ;;  %v1646_v9 = vld [vmem:[#allocation4 + $0x48] sm:$0xff]  ;;  %s1663_s16 = sshll.u32 %s1964_s24, 4 }
  0x51   : > { %536 = vmatpush.bf16.msra.mxu1 %v1474_v32  ;;  %1671 = vmatpush.bf16.msra.mxu3 %v1470_v31  ;;  %v1644_v7 = vld [vmem:[#allocation4 + $0x38] sm:$0xff]  ;;  %v1643_v8 = vld [vmem:[#allocation4 + $0x30] sm:$0xff]  ;;  %v1642_v10 = vld [vmem:[#allocation4 + $0x28] sm:$0xff]  ;;  %s1236_s7 = scalar_lea.hbm %s2277_s6, %s1663_s16 }
  0x52   : > { %v1641_v11 = vld [vmem:[#allocation4 + $0x20] sm:$0xff]  ;;  %v1640_v12 = vld [vmem:[#allocation4 + $0x18] sm:$0xff]  ;;  %v1639_v13 = vld [vmem:[#allocation4 + $0x10] sm:$0xff]  ;;  %s1239_s30 = sshll.u32 %s1236_s7, 4  ;;  %s1240_s30 = int_to_ptr.hbm [resolvable:$true] %s1239_s30 }
  0x53   : > { %v1645_v14 = vld [vmem:[#allocation4 + $0x40] sm:$0xff]  ;;  %v1638_v15 = vld [vmem:[#allocation4 + $0x8] sm:$0xff]  ;;  %v350_v17 = vld [vmem:[#allocation3] sm:$0x3]  ;;  %s1864_s14 = sshra.s32 %s1240_s30, 4  ;;  %s1865_s14 = int_to_ptr.hbm [resolvable:$true] %s1864_s14 }
  0x54   : > { %488 = vmatpush.bf16.msra.mxu0 %v1462_v37  ;;  %1672 = vmatpush.bf16.msra.mxu2 %v1462_v37  ;;  %v1637_v16 = vld [vmem:[#allocation4] sm:$0xff]  ;;  %v2148_v20 = vperm.slane %v350_v17, 0  ;;  %v2150_v21 = vperm.slane %v350_v17, 1  ;;  %s1866_s15 = scalar_lea.hbm %s1865_s14, 16  ;;  %p1871_p7 = scmp.lt.s32.totalorder %s1865_s14, %s2277_s6 }
  0x55   : > { %537 = vmatpush.bf16.msra.mxu1 %v1466_v38  ;;  %1673 = vmatpush.bf16.msra.mxu3 %v1462_v37  ;;  %p1867_p4 = scmp.ne.s32.totalorder %s1865_s14, %s1866_s15  ;;  %p1872_p8 = scmp.lt.s32.totalorder %s1870_s19, %s1866_s15 }
  0x57   : > { %p1868_p5 = pnand %p1867_p4, %p2068_p9  ;;  %p1873_p10 = por %p1872_p8, %p1871_p7 }
  0x58   : > { %489 = vmatpush.bf16.msra.mxu0 %v1454_v43  ;;  %1674 = vmatpush.bf16.msra.mxu2 %v1454_v43 }
  0x59   : > { %538 = vmatpush.bf16.msra.mxu1 %v1458_v44  ;;  %1675 = vmatpush.bf16.msra.mxu3 %v1454_v43  ;;  %p1869_p6 = pneg %p1868_p5 }
  0x5b   : > { %p1874_p13 = pnand %p1873_p10, %p1869_p6 }
  0x5c   : > { %490 = vmatpush.bf16.msra.mxu0 %v1446_v49  ;;  %1676 = vmatpush.bf16.msra.mxu2 %v1446_v49 }
  0x5d   : > { %539 = vmatpush.bf16.msra.mxu1 %v1450_v50  ;;  %1677 = vmatpush.bf16.msra.mxu3 %v1446_v49 }
  0x60   : > { %491 = vmatpush.bf16.msra.mxu0 %v1438_v55  ;;  %1678 = vmatpush.bf16.msra.mxu2 %v1438_v55 }
  0x61   : > { %540 = vmatpush.bf16.msra.mxu1 %v1442_v56  ;;  %1679 = vmatpush.bf16.msra.mxu3 %v1438_v55 }
  0x63   : > { %492 = vmatmul.bf16.vlgmr.msra.gmra.mxu0 %v1613_v58  ;;  %507 = vmatmul.bf16.vlgmr.msra.gmra.mxu2 %v1616_v59 }
  0x64   : > { %541 = vmatmul.bf16.vlgmr.msra.gmra.mxu1 %v1613_v58  ;;  %517 = vmatmul.bf16.vlgmr.msra.gmra.mxu3 %v1618_v1 }
  0x65   : > { %855 = vmatpush.bf16.msrb.mxu1 %v1652_v57  ;;  %1680 = vmatpush.bf16.msrb.mxu3 %v1652_v57 }
  0x66   : > { %806 = vmatpush.bf16.msrb.mxu2 %v1644_v7 }
  0x69   : > { %856 = vmatpush.bf16.msrb.mxu1 %v1651_v60  ;;  %1681 = vmatpush.bf16.msrb.mxu3 %v1651_v60 }
  0x6a   : > { %807 = vmatpush.bf16.msrb.mxu2 %v1643_v8 }
  0x6d   : > { %857 = vmatpush.bf16.msrb.mxu1 %v1650_v63  ;;  %1682 = vmatpush.bf16.msrb.mxu3 %v1650_v63 }
  0x6e   : > { %808 = vmatpush.bf16.msrb.mxu2 %v1642_v10 }
  0x71   : > { %858 = vmatpush.bf16.msrb.mxu1 %v1649_v2  ;;  %1683 = vmatpush.bf16.msrb.mxu3 %v1649_v2 }
  0x72   : > { %809 = vmatpush.bf16.msrb.mxu2 %v1641_v11 }
  0x73   : > { %497 = vmatmul.bf16.gmra.mxu0 %v1614_v61  ;;  %512 = vmatmul.bf16.gmra.mxu2 %v1617_v62 }
  0x74   : > { %546 = vmatmul.bf16.gmra.mxu1 %v1614_v61  ;;  %522 = vmatmul.bf16.gmra.mxu3 %v1619_v3 }
  0x75   : > { %859 = vmatpush.bf16.msrb.mxu1 %v1648_v4  ;;  %1684 = vmatpush.bf16.msrb.mxu3 %v1648_v4 }
  0x76   : > { %810 = vmatpush.bf16.msrb.mxu2 %v1640_v12 }
  0x79   : > { %860 = vmatpush.bf16.msrb.mxu1 %v1647_v6  ;;  %1685 = vmatpush.bf16.msrb.mxu3 %v1647_v6 }
  0x7a   : > { %811 = vmatpush.bf16.msrb.mxu2 %v1639_v13 }
  0x7d   : > { %861 = vmatpush.bf16.msrb.mxu1 %v1646_v9  ;;  %1686 = vmatpush.bf16.msrb.mxu3 %v1646_v9 }
  0x7e   : > { %812 = vmatpush.bf16.msrb.mxu2 %v1638_v15 }
  0x81   : > { %862 = vmatpush.bf16.msrb.mxu1 %v1645_v14  ;;  %1687 = vmatpush.bf16.msrb.mxu3 %v1645_v14 }
  0x82   : > { %813 = vmatpush.bf16.msrb.mxu2 %v1637_v16 }
  0x83   : > { %502 = vmatmul.bf16.gmra.mxu0 %v1615_v0 }
  0x84   : > { %551 = vmatmul.bf16.gmra.mxu1 %v1615_v0  ;;  %527 = vmatmul.bf16.gmra.mxu3 %v1620_v5 }
  0x94   : > { %556 = vmatmul.bf16.gmra.mxu1 %v1616_v59 }
  0xa4   : > { %561 = vmatmul.bf16.gmra.mxu1 %v1617_v62 }
  0xb4   : > { %566 = vmatmul.bf16.gmra.mxu1 %v1618_v1 }
  0xc4   : > { %571 = vmatmul.bf16.gmra.mxu1 %v1619_v3 }
  0xd4   : > { %576 = vmatmul.bf16.gmra.mxu1 %v1620_v5 }
  0xe0   : > { %v493_v18 = vpop.f32.mrf.mxu0 }
  0xe1   : > { %v542_v19 = vpop.f32.mrf.mxu1  ;;  %v494_v22 = vadd.f32 %v493_v18, %v2148_v20 }
  0xe2   : > { %v543_v23 = vadd.f32 %v542_v19, %v2150_v21 }
  0xe4   : > { %v582_v27 = vpack.c.bf16 %v543_v23, %v494_v22 }
  0xe6   : > { %v646_v30 = vunpack.c.l.b16 %v582_v27  ;;  %v647_v31 = vunpack.c.h.b16 %v582_v27  ;;  %v508_v58 = vpop.f32.mrf.mxu2 }
  0xe7   : > { %v509_v7 = vadd.f32 %v508_v58, %v2148_v20 }
  0xe8   : > { %v495_v24 = vpop.f32.mrf.mxu0 }
  0xe9   : > { %v496_v25 = vadd.f32 %v495_v24, %v2148_v20  ;;  %v544_v26 = vpop.f32.mrf.mxu1  ;;  %v518_v24 = vpop.f32.mrf.mxu3 }
  0xea   : > { %v545_v28 = vadd.f32 %v544_v26, %v2150_v21 }
  0xec   : > { %v583_v29 = vpack.c.bf16 %v545_v28, %v496_v25 }
  0xee   : > { %v648_v32 = vunpack.c.l.b16 %v583_v29  ;;  %v649_v33 = vunpack.c.h.b16 %v583_v29  ;;  %v510_v6 = vpop.f32.mrf.mxu2 }
  0xef   : > { %v511_v10 = vadd.f32 %v510_v6, %v2148_v20 }
  0xf0   : > { %v498_v34 = vpop.f32.mrf.mxu0  ;;  %v2156_v35 = vpack.c.b16 %v648_v32, %v646_v30  ;;  %v2158_v36 = vpack.c.b16 %v649_v33, %v647_v31 }
  0xf1   : > { %v547_v37 = vpop.f32.mrf.mxu1  ;;  %v499_v38 = vadd.f32 %v498_v34, %v2148_v20 }
  0xf2   : > { %814 = vmatmul.bf16.vlgmr.msrb.gmra.mxu2 %v2156_v35  ;;  %863 = vmatmul.bf16.vlgmr.msrb.gmra.mxu1 %v2158_v36  ;;  %v548_v39 = vadd.f32 %v547_v37, %v2150_v21 }
  0xf4   : > { %v584_v43 = vpack.c.bf16 %v548_v39, %v499_v38  ;;  %v520_v39 = vpop.f32.mrf.mxu3 }
  0xf6   : > { %v651_v46 = vunpack.c.h.b16 %v584_v43  ;;  %v650_v48 = vunpack.c.l.b16 %v584_v43  ;;  %v513_v14 = vpop.f32.mrf.mxu2  ;;  %v1660_v43 = vld [vmem:[#allocation5 + $0x38] sm:$0xff] }
  0xf7   : > { %v514_v25 = vadd.f32 %v513_v14, %v2148_v20  ;;  %992 = vmatpush.bf16.msrb.mxu0 %v1660_v43 }
  0xf8   : > { %v500_v40 = vpop.f32.mrf.mxu0 }
  0xf9   : > { %v501_v41 = vadd.f32 %v500_v40, %v2148_v20  ;;  %v549_v42 = vpop.f32.mrf.mxu1 }
  0xfa   : > { %v550_v44 = vadd.f32 %v549_v42, %v2150_v21 }
  0xfc   : > { %v585_v45 = vpack.c.bf16 %v550_v44, %v501_v41  ;;  %v519_v44 = vadd.f32 %v518_v24, %v2148_v20 }
  0xfe   : > { %v653_v47 = vunpack.c.h.b16 %v585_v45  ;;  %v652_v49 = vunpack.c.l.b16 %v585_v45  ;;  %v515_v27 = vpop.f32.mrf.mxu2 }
  0xff   : > { %v516_v29 = vadd.f32 %v515_v27, %v2148_v20 }
 0x100   : > { %v503_v50 = vpop.f32.mrf.mxu0  ;;  %v680_v51 = vpack.c.b16 %v652_v49, %v650_v48  ;;  %v681_v52 = vpack.c.b16 %v653_v47, %v651_v46  ;;  %v523_v46 = vpop.f32.mrf.mxu3 }
 0x101   : > { %v552_v53 = vpop.f32.mrf.mxu1  ;;  %v504_v54 = vadd.f32 %v503_v50, %v2148_v20  ;;  %v1659_v50 = vld [vmem:[#allocation5 + $0x28] sm:$0xff] }
 0x102   : > { %819 = vmatmul.bf16.gmra.mxu2 %v680_v51  ;;  %868 = vmatmul.bf16.vlgmr.msrb.gmra.mxu3 %v681_v52  ;;  %v553_v55 = vadd.f32 %v552_v53, %v2150_v21 }
 0x103   : > { %993 = vmatpush.bf16.msrb.mxu0 %v1659_v50 }
 0x104   : > { %v586_v60 = vpack.c.bf16 %v553_v55, %v504_v54  ;;  %v1658_v55 = vld [vmem:[#allocation5 + $0x20] sm:$0xff] }
 0x106   : > { %v654_v63 = vunpack.c.l.b16 %v586_v60  ;;  %v655_v1 = vunpack.c.h.b16 %v586_v60  ;;  %v1657_v60 = vld [vmem:[#allocation5 + $0x8] sm:$0xff] }
 0x107   : > { %994 = vmatpush.bf16.msrb.mxu0 %v1658_v55 }
 0x108   : > { %v505_v56 = vpop.f32.mrf.mxu0 }
 0x109   : > { %v506_v57 = vadd.f32 %v505_v56, %v2148_v20  ;;  %v554_v59 = vpop.f32.mrf.mxu1 }
 0x10a   : > { %v555_v61 = vadd.f32 %v554_v59, %v2150_v21  ;;  %v525_v59 = vpop.f32.mrf.mxu3 }
 0x10b   : > { %995 = vmatpush.bf16.msrb.mxu0 %v1657_v60 }
 0x10c   : > { %v587_v62 = vpack.c.bf16 %v555_v61, %v506_v57  ;;  %v524_v61 = vadd.f32 %v523_v46, %v2148_v20 }
 0x10e   : > { %v656_v0 = vunpack.c.l.b16 %v587_v62  ;;  %v657_v2 = vunpack.c.h.b16 %v587_v62 }
 0x110   : > { %v682_v3 = vpack.c.b16 %v656_v0, %v654_v63  ;;  %v683_v4 = vpack.c.b16 %v657_v2, %v655_v1  ;;  %v526_v0 = vadd.f32 %v525_v59, %v2148_v20 }
 0x111   : > { %v557_v5 = vpop.f32.mrf.mxu1 }
 0x112   : > { %824 = vmatmul.bf16.gmra.mxu2 %v682_v3  ;;  %873 = vmatmul.bf16.gmra.mxu3 %v683_v4  ;;  %v558_v8 = vadd.f32 %v557_v5, %v2150_v21  ;;  %v528_v5 = vpop.f32.mrf.mxu3 }
 0x113   : > { %v529_v14 = vadd.f32 %v528_v5, %v2148_v20 }
 0x114   : > { %v588_v11 = vpack.c.bf16 %v558_v8, %v509_v7 }
 0x116   : > { %v658_v15 = vunpack.c.l.b16 %v588_v11  ;;  %v659_v17 = vunpack.c.h.b16 %v588_v11 }
 0x119   : > { %v559_v9 = vpop.f32.mrf.mxu1 }
 0x11a   : > { %v560_v12 = vadd.f32 %v559_v9, %v2150_v21 }
 0x11c   : > { %v589_v13 = vpack.c.bf16 %v560_v12, %v511_v10  ;;  %v1655_v10 = vld [vmem:[#allocation5 + $0x18] sm:$0xff] }
 0x11e   : > { %v660_v16 = vunpack.c.l.b16 %v589_v13  ;;  %v661_v18 = vunpack.c.h.b16 %v589_v13 }
 0x120   : > { %v684_v19 = vpack.c.b16 %v660_v16, %v658_v15  ;;  %v685_v22 = vpack.c.b16 %v661_v18, %v659_v17  ;;  %v530_v16 = vpop.f32.mrf.mxu3  ;;  %v1654_v17 = vld [vmem:[#allocation5] sm:$0xff] }
 0x121   : > { %v562_v23 = vpop.f32.mrf.mxu1 }
 0x122   : > { %829 = vmatmul.bf16.gmra.mxu2 %v684_v19  ;;  %878 = vmatmul.bf16.gmra.mxu3 %v685_v22  ;;  %v563_v26 = vadd.f32 %v562_v23, %v2150_v21 }
 0x123   : > { %1144 = vmatpush.bf16.msra.mxu1 %v684_v19  ;;  %1157 = vmatpush.bf16.msra.mxu2 %v685_v22  ;;  %v531_v19 = vadd.f32 %v530_v16, %v2148_v20 }
 0x124   : > { %v590_v30 = vpack.c.bf16 %v563_v26, %v514_v25 }
 0x126   : > { %v662_v33 = vunpack.c.l.b16 %v590_v30  ;;  %v663_v37 = vunpack.c.h.b16 %v590_v30 }
 0x127   : > { %1145 = vmatpush.bf16.msra.mxu1 %v682_v3  ;;  %1158 = vmatpush.bf16.msra.mxu2 %v683_v4  ;;  %v1656_v3 = vld [vmem:[#allocation5 + $0x10] sm:$0xff] }
 0x128   : > { %996 = vmatpush.bf16.msrb.mxu0 %v1656_v3 }
 0x129   : > { %v564_v28 = vpop.f32.mrf.mxu1 }
 0x12a   : > { %v565_v31 = vadd.f32 %v564_v28, %v2150_v21 }
 0x12b   : > { %1146 = vmatpush.bf16.msra.mxu1 %v680_v51  ;;  %1159 = vmatpush.bf16.msra.mxu2 %v681_v52 }
 0x12c   : > { %v591_v32 = vpack.c.bf16 %v565_v31, %v516_v29  ;;  %997 = vmatpush.bf16.msrb.mxu0 %v1655_v10  ;;  %v1653_v31 = vld [vmem:[#allocation5 + $0x30] sm:$0xff] }
 0x12e   : > { %v664_v34 = vunpack.c.l.b16 %v591_v32  ;;  %v665_v38 = vunpack.c.h.b16 %v591_v32 }
 0x12f   : > { %1147 = vmatpush.bf16.msra.mxu1 %v2156_v35  ;;  %1160 = vmatpush.bf16.msra.mxu2 %v2158_v36  ;;  %v521_v36 = vadd.f32 %v520_v39, %v2148_v20 }
 0x130   : > { %v2180_v40 = vpack.c.b16 %v664_v34, %v662_v33  ;;  %v2182_v41 = vpack.c.b16 %v665_v38, %v663_v37  ;;  %998 = vmatpush.bf16.msrb.mxu0 %v1654_v17 }
 0x131   : > { %v567_v42 = vpop.f32.mrf.mxu1 }
 0x132   : > { %834 = vmatmul.bf16.gmra.mxu2 %v2180_v40  ;;  %883 = vmatmul.bf16.gmra.mxu3 %v2182_v41  ;;  %v568_v45 = vadd.f32 %v567_v42, %v2150_v21 }
 0x134   : > { %v592_v47 = vpack.c.bf16 %v568_v45, %v519_v44  ;;  %999 = vmatpush.bf16.msrb.mxu0 %v1653_v31 }
 0x136   : > { %v666_v51 = vunpack.c.l.b16 %v592_v47  ;;  %v667_v53 = vunpack.c.h.b16 %v592_v47 }
 0x139   : > { %v569_v35 = vpop.f32.mrf.mxu1 }
 0x13a   : > { %v570_v48 = vadd.f32 %v569_v35, %v2150_v21 }
 0x13c   : > { %v593_v49 = vpack.c.bf16 %v570_v48, %v521_v36 }
 0x13e   : > { %v668_v52 = vunpack.c.l.b16 %v593_v49  ;;  %v669_v54 = vunpack.c.h.b16 %v593_v49 }
 0x140   : > { %v688_v56 = vpack.c.b16 %v668_v52, %v666_v51  ;;  %v689_v57 = vpack.c.b16 %v669_v54, %v667_v53 }
 0x141   : > { %v572_v58 = vpop.f32.mrf.mxu1 }
 0x142   : > { %839 = vmatmul.bf16.gmra.mxu2 %v688_v56  ;;  %888 = vmatmul.bf16.gmra.mxu3 %v689_v57  ;;  %v573_v62 = vadd.f32 %v572_v58, %v2150_v21 }
 0x144   : > { %v594_v1 = vpack.c.bf16 %v573_v62, %v524_v61 }
 0x146   : > { %v670_v6 = vunpack.c.l.b16 %v594_v1  ;;  %v671_v8 = vunpack.c.h.b16 %v594_v1 }
 0x149   : > { %v574_v63 = vpop.f32.mrf.mxu1 }
 0x14a   : > { %v575_v2 = vadd.f32 %v574_v63, %v2150_v21 }
 0x14c   : > { %v595_v4 = vpack.c.bf16 %v575_v2, %v526_v0 }
 0x14e   : > { %v672_v7 = vunpack.c.l.b16 %v595_v4  ;;  %v673_v9 = vunpack.c.h.b16 %v595_v4 }
 0x150   : > { %v690_v11 = vpack.c.b16 %v672_v7, %v670_v6  ;;  %v691_v12 = vpack.c.b16 %v673_v9, %v671_v8 }
 0x151   : > { %v577_v13 = vpop.f32.mrf.mxu1 }
 0x152   : > { %844 = vmatmul.bf16.gmra.mxu2 %v690_v11  ;;  %893 = vmatmul.bf16.gmra.mxu3 %v691_v12  ;;  %v578_v15 = vadd.f32 %v577_v13, %v2150_v21 }
 0x154   : > { %v596_v22 = vpack.c.bf16 %v578_v15, %v529_v14 }
 0x156   : > { %v674_v25 = vunpack.c.l.b16 %v596_v22  ;;  %v675_v27 = vunpack.c.h.b16 %v596_v22 }
 0x159   : > { %v579_v18 = vpop.f32.mrf.mxu1 }
 0x15a   : > { %v580_v23 = vadd.f32 %v579_v18, %v2150_v21 }
 0x15c   : > { %v597_v24 = vpack.c.bf16 %v580_v23, %v531_v19 }
 0x15e   : > { %v676_v26 = vunpack.c.l.b16 %v597_v24  ;;  %v677_v28 = vunpack.c.h.b16 %v597_v24 }
 0x160   : > { %v692_v29 = vpack.c.b16 %v676_v26, %v674_v25  ;;  %v693_v30 = vpack.c.b16 %v677_v28, %v675_v27 }
 0x162   : > { %849 = vmatmul.bf16.gmra.mxu2 %v692_v29  ;;  %898 = vmatmul.bf16.gmra.mxu3 %v693_v30 }
 0x163   : > { %1173 = vmatpush.bf16.msra.mxu3 %v692_v29  ;;  %1186 = vmatpush.bf16.msrb.mxu1 %v693_v30 }
 0x167   : > { %1174 = vmatpush.bf16.msra.mxu3 %v690_v11  ;;  %1187 = vmatpush.bf16.msrb.mxu1 %v691_v12 }
 0x16b   : > { %1175 = vmatpush.bf16.msra.mxu3 %v688_v56  ;;  %1188 = vmatpush.bf16.msrb.mxu1 %v689_v57 }
 0x16f   : > { %1176 = vmatpush.bf16.msra.mxu3 %v2180_v40  ;;  %1189 = vmatpush.bf16.msrb.mxu1 %v2182_v41  ;;  %v864_v20 = vpop.f32.mrf.mxu1 }
 0x175   : > { %v815_v21 = vpop.f32.mrf.mxu2 }
 0x176   : > { %v865_v32 = vadd.f32 %v864_v20, %v815_v21 }
 0x177   : > { %v866_v33 = vpop.f32.mrf.mxu1 }
 0x178   : > { %v904_v38 = vmax.f32 %v865_v32, 0.0 }
 0x17d   : > { %v817_v34 = vpop.f32.mrf.mxu2 }
 0x17e   : > { %v867_v37 = vadd.f32 %v866_v33, %v817_v34 }
 0x180   : > { %v905_v39 = vmax.f32 %v867_v37, 0.0 }
 0x182   : > { %v920_v42 = vpack.c.bf16 %v905_v39, %v904_v38 }
 0x184   : > { %1000 = vmatmul.bf16.vlgmr.msrb.gmra.mxu0 %v920_v42 }
 0x185   : > { %v820_v43 = vpop.f32.mrf.mxu2  ;;  %v869_v44 = vpop.f32.mrf.mxu3 }
 0x186   : > { %v870_v45 = vadd.f32 %v869_v44, %v820_v43 }
 0x188   : > { %v906_v47 = vmax.f32 %v870_v45, 0.0 }
 0x18d   : > { %v822_v46 = vpop.f32.mrf.mxu2  ;;  %v871_v35 = vpop.f32.mrf.mxu3 }
 0x18e   : > { %v872_v36 = vadd.f32 %v871_v35, %v822_v46 }
 0x190   : > { %v907_v40 = vmax.f32 %v872_v36, 0.0 }
 0x192   : > { %v921_v48 = vpack.c.bf16 %v907_v40, %v906_v47 }
 0x194   : > { %1005 = vmatmul.bf16.gmra.mxu0 %v921_v48 }
 0x195   : > { %v825_v41 = vpop.f32.mrf.mxu2  ;;  %v874_v49 = vpop.f32.mrf.mxu3 }
 0x196   : > { %v875_v50 = vadd.f32 %v874_v49, %v825_v41 }
 0x198   : > { %v908_v54 = vmax.f32 %v875_v50, 0.0 }
 0x19d   : > { %v827_v51 = vpop.f32.mrf.mxu2  ;;  %v876_v52 = vpop.f32.mrf.mxu3 }
 0x19e   : > { %v877_v53 = vadd.f32 %v876_v52, %v827_v51 }
 0x1a0   : > { %v909_v55 = vmax.f32 %v877_v53, 0.0 }
 0x1a2   : > { %v922_v56 = vpack.c.bf16 %v909_v55, %v908_v54  ;;  %v1105_v54 = vlaneseq }
 0x1a4   : > { %1010 = vmatmul.bf16.gmra.mxu0 %v922_v56  ;;  %v1106_v55 = vand.u32 127, %v1105_v54 }
 0x1a5   : > { %v830_v57 = vpop.f32.mrf.mxu2  ;;  %v879_v58 = vpop.f32.mrf.mxu3 }
 0x1a6   : > { %v880_v59 = vadd.f32 %v879_v58, %v830_v57  ;;  %vm1107_vm0 = vcmp.lt.s32.totalorder %v1106_v55, 49 }
 0x1a8   : > { %v910_v63 = vmax.f32 %v880_v59, 0.0 }
 0x1ad   : > { %v832_v60 = vpop.f32.mrf.mxu2  ;;  %v881_v61 = vpop.f32.mrf.mxu3 }
 0x1ae   : > { %v882_v62 = vadd.f32 %v881_v61, %v832_v60 }
 0x1b0   : > { %v911_v0 = vmax.f32 %v882_v62, 0.0 }
 0x1b2   : > { %v923_v1 = vpack.c.bf16 %v911_v0, %v910_v63 }
 0x1b4   : > { %1015 = vmatmul.bf16.gmra.mxu0 %v923_v1 }
 0x1b5   : > { %v835_v2 = vpop.f32.mrf.mxu2  ;;  %v884_v3 = vpop.f32.mrf.mxu3 }
 0x1b6   : > { %v885_v4 = vadd.f32 %v884_v3, %v835_v2 }
 0x1b8   : > { %v912_v8 = vmax.f32 %v885_v4, 0.0 }
 0x1bd   : > { %v837_v5 = vpop.f32.mrf.mxu2  ;;  %v886_v6 = vpop.f32.mrf.mxu3 }
 0x1be   : > { %v887_v7 = vadd.f32 %v886_v6, %v837_v5 }
 0x1c0   : > { %v913_v9 = vmax.f32 %v887_v7, 0.0 }
 0x1c2   : > { %v924_v10 = vpack.c.bf16 %v913_v9, %v912_v8 }
 0x1c4   : > { %1020 = vmatmul.bf16.gmra.mxu0 %v924_v10 }
 0x1c5   : > { %v840_v11 = vpop.f32.mrf.mxu2  ;;  %v889_v12 = vpop.f32.mrf.mxu3 }
 0x1c6   : > { %v890_v13 = vadd.f32 %v889_v12, %v840_v11 }
 0x1c8   : > { %v914_v17 = vmax.f32 %v890_v13, 0.0 }
 0x1cd   : > { %v842_v14 = vpop.f32.mrf.mxu2  ;;  %v891_v15 = vpop.f32.mrf.mxu3 }
 0x1ce   : > { %v892_v16 = vadd.f32 %v891_v15, %v842_v14 }
 0x1d0   : > { %v915_v18 = vmax.f32 %v892_v16, 0.0 }
 0x1d2   : > { %v925_v19 = vpack.c.bf16 %v915_v18, %v914_v17 }
 0x1d4   : > { %1025 = vmatmul.bf16.gmra.mxu0 %v925_v19 }
 0x1d5   : > { %v845_v22 = vpop.f32.mrf.mxu2  ;;  %v894_v23 = vpop.f32.mrf.mxu3 }
 0x1d6   : > { %v895_v24 = vadd.f32 %v894_v23, %v845_v22 }
 0x1d8   : > { %v916_v28 = vmax.f32 %v895_v24, 0.0 }
 0x1dd   : > { %v847_v25 = vpop.f32.mrf.mxu2  ;;  %v896_v26 = vpop.f32.mrf.mxu3 }
 0x1de   : > { %v897_v27 = vadd.f32 %v896_v26, %v847_v25 }
 0x1e0   : > { %v917_v29 = vmax.f32 %v897_v27, 0.0 }
 0x1e2   : > { %v926_v30 = vpack.c.bf16 %v917_v29, %v916_v28 }
 0x1e4   : > { %1030 = vmatmul.bf16.gmra.mxu0 %v926_v30 }
 0x1e5   : > { %v850_v31 = vpop.f32.mrf.mxu2  ;;  %v899_v20 = vpop.f32.mrf.mxu3 }
 0x1e6   : > { %v900_v21 = vadd.f32 %v899_v20, %v850_v31 }
 0x1e8   : > { %v918_v37 = vmax.f32 %v900_v21, 0.0 }
 0x1ed   : > { %v852_v32 = vpop.f32.mrf.mxu2  ;;  %v901_v33 = vpop.f32.mrf.mxu3 }
 0x1ee   : > { %v902_v34 = vadd.f32 %v901_v33, %v852_v32 }
 0x1f0   : > { %v919_v38 = vmax.f32 %v902_v34, 0.0 }
 0x1f2   : > { %v927_v39 = vpack.c.bf16 %v919_v38, %v918_v37 }
 0x1f4   : > { %1035 = vmatmul.bf16.gmra.mxu0 %v927_v39 }
 0x201   : > { %v1001_v42 = vpop.f32.mrf.mxu0 }
 0x202   : > { %1041 = vxpose.xlu0.b32.start [1/8] (short) (narrow) %v1001_v42, 8 }
 0x209   : > { %v1003_v43 = vpop.f32.mrf.mxu0 }
 0x20a   : > { %1042 = vxpose.xlu0.b32.cont [2/8] (short) (narrow) %v1003_v43, 8 }
 0x211   : > { %v1006_v44 = vpop.f32.mrf.mxu0 }
 0x212   : > { %1043 = vxpose.xlu0.b32.cont [3/8] (short) (narrow) %v1006_v44, 8 }
 0x219   : > { %v1008_v45 = vpop.f32.mrf.mxu0 }
 0x21a   : > { %1044 = vxpose.xlu0.b32.cont [4/8] (short) (narrow) %v1008_v45, 8 }
 0x221   : > { %v1011_v46 = vpop.f32.mrf.mxu0 }
 0x222   : > { %1045 = vxpose.xlu0.b32.cont [5/8] (short) (narrow) %v1011_v46, 8 }
 0x229   : > { %v1013_v35 = vpop.f32.mrf.mxu0 }
 0x22a   : > { %1046 = vxpose.xlu0.b32.cont [6/8] (short) (narrow) %v1013_v35, 8 }
 0x231   : > { %v1016_v36 = vpop.f32.mrf.mxu0 }
 0x232   : > { %1047 = vxpose.xlu0.b32.cont [7/8] (short) (narrow) %v1016_v36, 8 }
 0x239   : > { %v1018_v47 = vpop.f32.mrf.mxu0 }
 0x23a   : > { %1048 = vxpose.xlu0.b32.end [8/8] (short) (narrow) %v1018_v47, 8 }
 0x241   : > { %v1021_v40 = vpop.f32.mrf.mxu0 }
 0x242   : > { %1073 = vxpose.xlu1.b32.start [1/8] (short) (narrow) %v1021_v40, 8 }
 0x249   : > { %v1023_v48 = vpop.f32.mrf.mxu0 }
 0x24a   : > { %1074 = vxpose.xlu1.b32.cont [2/8] (short) (narrow) %v1023_v48, 8 }
 0x251   : > { %v1026_v41 = vpop.f32.mrf.mxu0 }
 0x252   : > { %1075 = vxpose.xlu1.b32.cont [3/8] (short) (narrow) %v1026_v41, 8 }
 0x259   : > { %v1028_v49 = vpop.f32.mrf.mxu0 }
 0x25a   : > { %1076 = vxpose.xlu1.b32.cont [4/8] (short) (narrow) %v1028_v49, 8 }
 0x261   : > { %v1031_v50 = vpop.f32.mrf.mxu0 }
 0x262   : > { %1077 = vxpose.xlu1.b32.cont [5/8] (short) (narrow) %v1031_v50, 8 }
 0x269   : > { %v1033_v51 = vpop.f32.mrf.mxu0 }
 0x26a   : > { %1078 = vxpose.xlu1.b32.cont [6/8] (short) (narrow) %v1033_v51, 8 }
 0x271   : > { %v1036_v52 = vpop.f32.mrf.mxu0 }
 0x272   : > { %1079 = vxpose.xlu1.b32.cont [7/8] (short) (narrow) %v1036_v52, 8 }
 0x279   : > { %v1038_v53 = vpop.f32.mrf.mxu0 }
 0x27a   : > { %1080 = vxpose.xlu1.b32.end [8/8] (short) (narrow) %v1038_v53, 8 }
 0x2a6   : > { %v1057_v56 = vpop.trf.xlu0 }
 0x2a7   : > { %v1108_v57 = vsel %vm1107_vm0, %v1057_v56, -1e+30 }
 0x2a8   : > { %v1111_v58 = vsel %vm1110_vm1, %v1108_v57, -inf }
 0x2a9   : > { %1112 = vmax.xlane.f32.xlu2 %v1111_v58 }
 0x2e6   : > { %v1089_v59 = vpop.trf.xlu1 }
 0x2e7   : > { %v1109_v60 = vsel %vm1107_vm0, %v1089_v59, -1e+30 }
 0x2e8   : > { %v1114_v61 = vsel %vm1110_vm1, %v1109_v60, -inf }
 0x2e9   : > { %1115 = vmax.xlane.f32.xlu2 %v1114_v61 }
 0x31c   : > { %v1113_v62 = vpop.xlane.xlu2 %1112 }
 0x31d   : > { %v1117_v63 = vsub.f32 %v1108_v57, %v1113_v62 }
 0x31f   : > { %v1119_v0 = vmul.f32 1.442695, %v1117_v63 }
 0x321   : > { %1764 = vpow2.f32 %v1119_v0 }
 0x327   : > { %v1765_v1 = vpop.eup %1764 }
 0x328   : > { %v1123_v2 = vsel %vm1110_vm1, %v1765_v1, 0.0 }
 0x329   : > { %1124 = vadd.xlane.f32.xlu2 %v1123_v2 }
 0x35c   : > { %v1116_v3 = vpop.xlane.xlu2 %1115 }
 0x35d   : > { %v1118_v4 = vsub.f32 %v1109_v60, %v1116_v3 }
 0x35f   : > { %v1121_v5 = vmul.f32 1.442695, %v1118_v4 }
 0x361   : > { %1766 = vpow2.f32 %v1121_v5 }
 0x367   : > { %v1767_v6 = vpop.eup %1766 }
 0x368   : > { %v1126_v7 = vsel %vm1110_vm1, %v1767_v6, 0.0 }
 0x369   : > { %1127 = vadd.xlane.f32.xlu2 %v1126_v7 }
 0x39c   : > { %v1125_v8 = vpop.xlane.xlu2 %1124 }
 0x39d   : > { %1768 = vrcp.f32 %v1125_v8 }
 0x3a3   : > { %v1769_v9 = vpop.eup %1768 }
 0x3a4   : > { %v1131_v10 = vmul.f32 %v1769_v9, %v1765_v1 }
 0x3a6   : > { %1133 = vst.msk [vmem:[%s2111_s8] sm:$0xff] %vm1110_vm1, %v1131_v10  ;;  %v1135_v11 = vpack.c.bf16 %v1131_v10, %v1131_v10 }
 0x3a8   : > { %1595 = vmatmul.msk.bf16.vlgmr.msra.gmra.mxu1 %vm1110_vm1, %v1135_v11  ;;  %1596 = vmatmul.msk.bf16.vlgmr.msra.gmra.mxu2 %vm1110_vm1, %v1135_v11 }
 0x3dc   : > { %v1128_v12 = vpop.xlane.xlu2 %1127 }
 0x3dd   : > { %1770 = vrcp.f32 %v1128_v12 }
 0x3e3   : > { %v1771_v13 = vpop.eup %1770 }
 0x3e4   : > { %v1132_v14 = vmul.f32 %v1771_v13, %v1767_v6 }
 0x3e6   : > { %1134 = vst.msk [vmem:[%s2111_s8 + $0x8] sm:$0xff] %vm1110_vm1, %v1132_v14  ;;  %v1136_v15 = vpack.c.bf16 %v1132_v14, %v1132_v14 }
 0x3e8   : > { %1597 = vmatmul.msk.bf16.vlgmr.msra.gmra.mxu3 %vm1110_vm1, %v1136_v15  ;;  %1598 = vmatmul.msk.bf16.vlgmr.msrb.gmra.mxu1 %vm1110_vm1, %v1136_v15 }
 0x3e9   : > { %1877 = shalt.err (!%p1874_p13)
}
 0x3ea   : > { %s1978_s8 = smov 128   ;;  %s1979_s16 = smov 8  }
 0x3eb   : > { %1691 = dma.vmem_to_hbm [thread:$0]  (%p2068_p9), %s1238_s13, 256, %s1240_s30, %s1205_s0, %s1978_s8, %s1978_s8, %s1979_s16  }
 0x3ec   : > { %s1662_s17 = sshll.u32 %s1964_s24, 5  ;;  %s1219_s15 = sshll.u32 %s2109_s9, 4  ;;  %s1220_s15 = int_to_ptr.vmem [resolvable:$true] %s1219_s15 }
 0x3ed   : > { %s1218_s14 = scalar_lea.hbm %s2276_s5, %s1662_s17  ;;  %s1200_s13 = scalar_lea.sflag [#allocation9], %s2091_s29 }
 0x3ee   : > { %s1221_s18 = sshll.u32 %s1218_s14, 4  ;;  %s1898_s19 = scalar_lea.hbm %s2276_s5, 64  ;;  %s1222_s18 = int_to_ptr.hbm [resolvable:$true] %s1221_s18 }
 0x3ef   : > { %s1892_s30 = sshra.s32 %s1222_s18, 4  ;;  %s1893_s30 = int_to_ptr.hbm [resolvable:$true] %s1892_s30 }
 0x3f0   : > { %s1894_s0 = scalar_lea.hbm %s1893_s30, 32  ;;  %p1899_p3 = scmp.lt.s32.totalorder %s1893_s30, %s2276_s5 }
 0x3f1   : > { %p1895_p0 = scmp.ne.s32.totalorder %s1893_s30, %s1894_s0  ;;  %p1900_p4 = scmp.lt.s32.totalorder %s1898_s19, %s1894_s0 }
 0x3f3   : > { %p1896_p1 = pnand %p1895_p0, %p2068_p9  ;;  %p1901_p5 = por %p1900_p4, %p1899_p3 }
 0x3f5   : > { %p1897_p2 = pneg %p1896_p1 }
 0x3f7   : > { %p1902_p6 = pnand %p1901_p5, %p1897_p2 }
 0x425   : > { %v1149_v16 = vpop.f32.mrf.mxu1 }
 0x426   : > { %1195 = vst [vmem:[%s2109_s9] sm:$0xff] %v1149_v16 }
 0x42b   : > { %v1162_v17 = vpop.f32.mrf.mxu2 }
 0x42c   : > { %1196 = vst [vmem:[%s2109_s9 + $0x8] sm:$0xff] %v1162_v17 }
 0x42d   : > { %v1151_v18 = vpop.f32.mrf.mxu1 }
 0x433   : > { %v1164_v19 = vpop.f32.mrf.mxu2 }
 0x465   : > { %v1191_v22 = vpop.f32.mrf.mxu1 }
 0x466   : > { %1198 = vst [vmem:[%s2109_s9 + $0x18] sm:$0xff] %v1191_v22 }
 0x46b   : > { %v1178_v23 = vpop.f32.mrf.mxu3 }
 0x46c   : > { %1197 = vst [vmem:[%s2109_s9 + $0x10] sm:$0xff] %v1178_v23 }
 0x46d   : > { %v1193_v24 = vpop.f32.mrf.mxu1 }
 0x46e   : > { %1905 = shalt.err (!%p1902_p6)
}
 0x46f   : > { %s1980_s29 = smov 256   ;;  %s1981_s9 = smov 16  }
 0x470   : > { %1690 = dma.vmem_to_hbm [thread:$0]  (%p2068_p9), %s1220_s15, 512, %s1222_s18, %s1200_s13, %s1980_s29, %s1980_s29, %s1981_s9  }
 0x473   : > { %v1180_v25 = vpop.f32.mrf.mxu3 }
 0x474 PF: > { %s1254_s8 = sand.u32 1, %s1952_s21   ;;  %p1699_p7 = pnand %p1395_p12, %p2075_p11 }
 0x475   : > { %s1255_s16 = scalar_lea.sflag [#allocation9], %s1254_s8 }
 0x476   : > { %p1700_p8 = pneg %p1699_p7 }
 0x478   : > { %1943 = dma.done.wait (%p1700_p8), %s1255_s16, 512  }
 0x479   : > { %1945 = vsyncadd (%p1700_p8), %s1255_s16, 4294966784  ;;  %s1265_s17 = scalar_lea.sflag [#allocation12], %s1254_s8 }
 0x47a   : > { %1947 = dma.done.wait (%p1700_p8), %s1265_s17, 256  }
 0x47b   : > { %1949 = vsyncadd (%p1700_p8), %s1265_s17, 4294967040  ;;  %s26_s26 = sadd.s32 1, %s1972_s26   ;;  %s2288_s10 = sld [smem:[#allocation28_spill]] }
 0x47c   : > { %p23_p10 = scmp.ge.s32.totalorder %s26_s26, 4   ;;  %s2289_s21 = smov %s1956_s22 }
 0x47d   : > { %s2290_s22 = smov %s1960_s23  ;;  %s2291_s23 = smov %s2073_s11 }
 0x47e   : > { %s2292_s24 = smov %s1968_s25  ;;  %25 = sbr.rel (!%p23_p10) target bundleno = 11 (0xb), region = 161 }
 0x481   : > { %s2293_s25 = smov %s2288_s10 }
 0x483   :  { %1271 = vsyncpa [#allocation8], 1 }
 0x484   :  { %1273 = vsyncpa [#allocation8 + $0x1], 1 }
 0x485   :  { %1274 = vsyncpa [#allocation9], 1 }
 0x486   :  { %1276 = vsyncpa [#allocation9 + $0x1], 1 }
 0x487   :  { %1277 = vsyncpa [#allocation12], 1 }
 0x488   :  { %1279 = vsyncpa [#allocation12 + $0x1], 1 }
 0x489   :  { %1280 = vsyncmov [#allocation6] }
 0x48c   :  { %s1281_s12 = vpop.sfrf %1280 }
 0x48d   :  { %p1608_p9 = scmp.ne.s32.totalorder %s1281_s12, 0 }
 0x48f   :  { %1285 = shalt.err (%p1608_p9)  }
 0x490   :  { %1287 = vsyncmov [#allocation6 + $0x1] }
 0x493   :  { %s1288_s28 = vpop.sfrf %1287 }
 0x494   :  { %p1609_p11 = scmp.ne.s32.totalorder %s1288_s28, 0 }
 0x496   :  { %1292 = shalt.err (%p1609_p11)  }
 0x497   :  { %1294 = vsyncmov [#allocation6 + $0x2] }
 0x49a   :  { %s1295_s11 = vpop.sfrf %1294 }
 0x49b   :  { %p1610_p12 = scmp.ne.s32.totalorder %s1295_s11, 0 }
 0x49d   :  { %1299 = shalt.err (%p1610_p12)  }
 0x49e   :  { %1301 = vsyncmov [#allocation6 + $0x3] }
 0x4a1   :  { %s1302_s26 = vpop.sfrf %1301 }
 0x4a2   :  { %p1611_p13 = scmp.ne.s32.totalorder %s1302_s26, 0 }
 0x4a4   :  { %1306 = shalt.err (%p1611_p13)  }

</bundles_post_ra>
